<compile_context>
chip_gen: v5e
topology: v5e:2x2
jax: 0.10.0
libtpu: 0.0.40
codegen_flags: <defaults>
</compile_context>

<pallas_src>
import numpy as np
import jax
import jax.numpy as jnp
from jax.experimental import pallas as pl
from jax.experimental.pallas import tpu as pltpu


def vae_kernel(
    x_ref, eps_ref,
    w1_ref, b1_ref,
    wheads_ref, bheads_ref,
    wd1_ref, bd1_ref,
    wd2_ref, bd2_ref,
    out_ref, musig_ref,
):
    x = x_ref[...]          # [tb, Din]  bf16 (cast once in the wrapper)
    eps = eps_ref[...]      # [tb, Zp]   f32 (padded lanes are exactly zero)
    zp = eps.shape[-1]

    # ---- encoder hidden layer (bf16 MXU, f32 accumulate) ----
    h = jnp.dot(x, w1_ref[...], preferred_element_type=jnp.float32) + b1_ref[...]
    h = jnp.maximum(h, 0.0)                                           # ReLU

    # ---- fused latent heads: [tb, 2*Zp] = mu | sigma (single matmul) ----
    musig = jnp.dot(h.astype(jnp.bfloat16), wheads_ref[...],
                    preferred_element_type=jnp.float32) + bheads_ref[...]
    mu = musig[:, :zp]
    sigma = musig[:, zp:]

    # ---- rand_sampling: mu + randn * exp(sigma / 2) ----
    # Padded lanes: mu=0, eps=0, sigma=0 -> sample=0 (no overflow possible).
    sample = mu + eps * jnp.exp(sigma * 0.5)

    # ---- decoder ----
    hd = jnp.dot(sample.astype(jnp.bfloat16), wd1_ref[...],
                 preferred_element_type=jnp.float32) + bd1_ref[...]
    hd = jnp.maximum(hd, 0.0)                                         # ReLU

    logits = jnp.dot(hd.astype(jnp.bfloat16), wd2_ref[...],
                     preferred_element_type=jnp.float32) + bd2_ref[...]
    out_ref[...] = jax.nn.sigmoid(logits)
    musig_ref[...] = musig                                            # lane-dense 128-wide slab


def _round_up(a, m):
    return ((a + m - 1) // m) * m


def vae_forward(x_nchw, eps, params):
    """x_nchw: [B, C, H, W] float32, eps: [B, Z] float32.
    Returns (output [B, D_in] f32, mu [B, Z] f32, sigma [B, Z] f32)."""
    B = x_nchw.shape[0]
    d_in = int(np.prod(x_nchw.shape[1:]))
    x = x_nchw.reshape(B, d_in)

    (w1, b1, wmu, bmu, wsig, bsig, wd1, bd1, wd2, bd2) = params
    hid = w1.shape[1]
    Z = wmu.shape[1]

    # ---- padded sizes (lane / sublane friendly) ----
    HID_P = max(128, _round_up(hid, 128))          # hidden -> full 128-lane granule
    Z_P = max(64, _round_up(Z, 64))                # latent -> 64 so mu|sigma slab is 128*k lanes
    SLAB = 2 * Z_P

    f32, bf16 = jnp.float32, jnp.bfloat16

    # ---- pack / pad / cast parameters once in the wrapper (all pads are exact zeros) ----
    w1_p = jnp.zeros((d_in, HID_P), f32).at[:, :hid].set(w1).astype(bf16)
    b1_p = jnp.zeros((1, HID_P), f32).at[:, :hid].set(b1)

    wheads_p = jnp.zeros((HID_P, SLAB), f32)
    wheads_p = wheads_p.at[:hid, :Z].set(wmu).at[:hid, Z_P:Z_P + Z].set(wsig).astype(bf16)
    bheads_p = jnp.zeros((1, SLAB), f32).at[:, :Z].set(bmu).at[:, Z_P:Z_P + Z].set(bsig)

    wd1_p = jnp.zeros((Z_P, HID_P), f32).at[:Z, :hid].set(wd1).astype(bf16)
    bd1_p = jnp.zeros((1, HID_P), f32).at[:, :hid].set(bd1)
    wd2_p = jnp.zeros((HID_P, d_in), f32).at[:hid, :].set(wd2).astype(bf16)
    bd2_p = b1.dtype.type(0) + bd2                                  # [1, d_in] f32 (no padding needed)

    # ---- batch tiling: pad to sublane granule, split for pipelining / megacore ----
    B_pad = _round_up(B, 8)
    if B_pad <= 8:
        tb = B_pad
    else:
        # >=2 grid iterations (v7x: shards across both TensorCores), cap at 512 rows
        # so double-buffered x (bf16) + out (f32) stays well inside v7x's 64 MiB VMEM.
        half = max(8, (B_pad // 2) // 8 * 8)
        tb = min(512, half)
    grid_n = -(-B_pad // tb)
    B_full = grid_n * tb

    # Pad inputs (zero rows / zero latent lanes) and ship x as bf16 (kernel casts anyway).
    x_p = jnp.zeros((B_full, d_in), f32).at[:B, :].set(x).astype(bf16)
    eps_p = jnp.zeros((B_full, Z_P), f32).at[:B, :Z].set(eps)

    def batched(shape):   # tile over rows, follow the grid index
        return pl.BlockSpec((tb,) + tuple(shape[1:]),
                            lambda i: (i,) + (0,) * (len(shape) - 1))

    def pinned(shape):    # constant index_map -> DMA'd once, stays VMEM-resident
        return pl.BlockSpec(tuple(shape), lambda i: (0,) * len(shape))

    in_specs = [
        batched((B_full, d_in)),     # x (bf16)
        batched((B_full, Z_P)),      # eps
        pinned(w1_p.shape),          # w1
        pinned(b1_p.shape),          # b1
        pinned(wheads_p.shape),      # w_heads (mu | sigma)
        pinned(bheads_p.shape),      # b_heads
        pinned(wd1_p.shape),         # wd1
        pinned(bd1_p.shape),         # bd1
        pinned(wd2_p.shape),         # wd2
        pinned(bd2_p.shape),         # bd2
    ]
    out_specs = (
        batched((B_full, d_in)),     # reconstruction
        batched((B_full, SLAB)),     # mu | sigma slab (128-lane dense)
    )
    out_shapes = (
        jax.ShapeDtypeStruct((B_full, d_in), f32),
        jax.ShapeDtypeStruct((B_full, SLAB), f32),
    )

    inputs = (x_p, eps_p, w1_p, b1_p, wheads_p, bheads_p, wd1_p, bd1_p, wd2_p, bd2_p)
    flops = 2 * B_full * (d_in * HID_P + HID_P * SLAB + Z_P * HID_P + HID_P * d_in)
    transcendentals = B_full * (Z_P + d_in)                    # exp + sigmoid
    bytes_accessed = sum(int(np.prod(a.shape)) * a.dtype.itemsize for a in inputs) \
        + B_full * d_in * 4 + B_full * SLAB * 4

    out, musig = pl.pallas_call(
        vae_kernel,
        grid=(grid_n,),
        in_specs=in_specs,
        out_specs=out_specs,
        out_shape=out_shapes,
        compiler_params=pltpu.CompilerParams(
            dimension_semantics=("parallel",)),
        cost_estimate=pl.CostEstimate(
            flops=flops,
            transcendentals=transcendentals,
            bytes_accessed=bytes_accessed),
    )(*inputs)

    out = out[:B, :]
    mu = musig[:B, :Z]
    sigma = musig[:B, Z_P:Z_P + Z]
    return out, mu, sigma


def init_params(key, d_in, hidden, latent):
    """Deterministic synthetic parameters (biases kept 2D [1, N] for TPU layout)."""
    ks = jax.random.split(key, 10)
    s = 0.05
    w1 = jax.random.normal(ks[0], (d_in, hidden), jnp.float32) * s
    b1 = jax.random.normal(ks[1], (1, hidden), jnp.float32) * s
    wmu = jax.random.normal(ks[2], (hidden, latent), jnp.float32) * s
    bmu = jax.random.normal(ks[3], (1, latent), jnp.float32) * s
    wsig = jax.random.normal(ks[4], (hidden, latent), jnp.float32) * s
    bsig = jax.random.normal(ks[5], (1, latent), jnp.float32) * s
    wd1 = jax.random.normal(ks[6], (latent, hidden), jnp.float32) * s
    bd1 = jax.random.normal(ks[7], (1, hidden), jnp.float32) * s
    wd2 = jax.random.normal(ks[8], (hidden, d_in), jnp.float32) * s
    bd2 = jax.random.normal(ks[9], (1, d_in), jnp.float32) * s
    return (w1, b1, wmu, bmu, wsig, bsig, wd1, bd1, wd2, bd2)


def _ref_forward(x_nchw, eps, params):
    """Pure-JAX reference using the same bf16-operand / f32-accumulate math."""
    B = x_nchw.shape[0]
    d_in = int(np.prod(x_nchw.shape[1:]))
    xf = x_nchw.reshape(B, d_in)
    (w1, b1, wmu, bmu, wsig, bsig, wd1, bd1, wd2, bd2) = params
    bf = jnp.bfloat16

    def mm(a, w):
        return jnp.dot(a.astype(bf), w.astype(bf), preferred_element_type=jnp.float32)

    h = jnp.maximum(mm(xf, w1) + b1, 0.0)
    mu = mm(h, wmu) + bmu
    sg = mm(h, wsig) + bsig
    smp = mu + eps * jnp.exp(sg * 0.5)
    hd = jnp.maximum(mm(smp, wd1) + bd1, 0.0)
    out = jax.nn.sigmoid(mm(hd, wd2) + bd2)
    return out, mu, sg


if __name__ == "__main__":
    key = jax.random.PRNGKey(0)
    k_x, k_eps, k_p = jax.random.split(key, 3)

    B, C, H, W = 2, 4, 16, 16
    D_IN = C * H * W          # 1024
    HIDDEN = 32
    LATENT = 8

    x = jax.random.normal(k_x, (B, C, H, W), jnp.float32)
    # torch.randn_like(mu) -> deterministic standard-normal noise here
    eps = jax.random.normal(k_eps, (B, LATENT), jnp.float32)
    params = init_params(k_p, D_IN, HIDDEN, LATENT)

    out, mu, sigma = jax.jit(vae_forward)(x, eps, params)
    jax.block_until_ready((out, mu, sigma))

    out_r, mu_r, sg_r = _ref_forward(x, eps, params)

    assert out.shape == (B, D_IN) and mu.shape == (B, LATENT) and sigma.shape == (B, LATENT)
    assert jnp.allclose(out, out_r, atol=2e-3, rtol=2e-3)
    assert jnp.allclose(mu, mu_r, atol=2e-3, rtol=2e-3)
    assert jnp.allclose(sigma, sg_r, atol=2e-3, rtol=2e-3)

    print("KERNEL_OK")
</pallas_src>

<mosaic_0001>
module attributes {stable_mosaic.version = 11 : i64} {
  func.func @vae_kernel(%arg0: i32, %arg1: memref<8x1024xbf16, #tpu.memory_space<vmem>>, %arg2: memref<8x64xf32, #tpu.memory_space<vmem>>, %arg3: memref<1024x128xbf16, #tpu.memory_space<vmem>>, %arg4: memref<1x128xf32, #tpu.memory_space<vmem>>, %arg5: memref<128x128xbf16, #tpu.memory_space<vmem>>, %arg6: memref<1x128xf32, #tpu.memory_space<vmem>>, %arg7: memref<64x128xbf16, #tpu.memory_space<vmem>>, %arg8: memref<1x128xf32, #tpu.memory_space<vmem>>, %arg9: memref<128x1024xbf16, #tpu.memory_space<vmem>>, %arg10: memref<1x1024xf32, #tpu.memory_space<vmem>>, %arg11: memref<8x1024xf32, #tpu.memory_space<vmem>>, %arg12: memref<8x128xf32, #tpu.memory_space<vmem>>) attributes {dimension_semantics = [#tpu.dimension_semantics<parallel>], iteration_bounds = array<i64: 1>, scalar_prefetch = 0 : i64, scratch_operands = 0 : i64, tpu.core_type = #tpu.core_type<tc>, window_params = [{transform_indices = @transform_0, window_bounds = array<i64: 8, 1024>}, {transform_indices = @transform_1, window_bounds = array<i64: 8, 64>}, {pipeline_mode = #tpu.pipeline_mode<synchronous>, transform_indices = @transform_2, window_bounds = array<i64: 1024, 128>}, {pipeline_mode = #tpu.pipeline_mode<synchronous>, transform_indices = @transform_3, window_bounds = array<i64: 1, 128>}, {pipeline_mode = #tpu.pipeline_mode<synchronous>, transform_indices = @transform_4, window_bounds = array<i64: 128, 128>}, {pipeline_mode = #tpu.pipeline_mode<synchronous>, transform_indices = @transform_5, window_bounds = array<i64: 1, 128>}, {pipeline_mode = #tpu.pipeline_mode<synchronous>, transform_indices = @transform_6, window_bounds = array<i64: 64, 128>}, {pipeline_mode = #tpu.pipeline_mode<synchronous>, transform_indices = @transform_7, window_bounds = array<i64: 1, 128>}, {pipeline_mode = #tpu.pipeline_mode<synchronous>, transform_indices = @transform_8, window_bounds = array<i64: 128, 1024>}, {pipeline_mode = #tpu.pipeline_mode<synchronous>, transform_indices = @transform_9, window_bounds = array<i64: 1, 1024>}, {transform_indices = @transform_10, window_bounds = array<i64: 8, 1024>}, {transform_indices = @transform_11, window_bounds = array<i64: 8, 128>}]} {
    %c0 = arith.constant 0 : index
    %c0_0 = arith.constant 0 : index
    %0 = vector.load %arg1[%c0, %c0_0] : memref<8x1024xbf16, #tpu.memory_space<vmem>>, vector<8x1024xbf16>
    %c0_1 = arith.constant 0 : index
    %c0_2 = arith.constant 0 : index
    %1 = vector.load %arg2[%c0_1, %c0_2] : memref<8x64xf32, #tpu.memory_space<vmem>>, vector<8x64xf32>
    %c0_3 = arith.constant 0 : index
    %c0_4 = arith.constant 0 : index
    %2 = vector.load %arg3[%c0_3, %c0_4] : memref<1024x128xbf16, #tpu.memory_space<vmem>>, vector<1024x128xbf16>
    %cst = arith.constant dense<0.000000e+00> : vector<8x128xf32>
    %3 = tpu.matmul %0, %2, %cst {dimension_numbers = #tpu.dot_dimension_numbers<[1], [0], [0], [1], [0, 0, 1, 1], [], []>} : vector<8x1024xbf16>, vector<1024x128xbf16>, vector<8x128xf32> -> vector<8x128xf32>
    %c0_5 = arith.constant 0 : index
    %c0_6 = arith.constant 0 : index
    %4 = vector.load %arg4[%c0_5, %c0_6] : memref<1x128xf32, #tpu.memory_space<vmem>>, vector<1x128xf32>
    %5 = vector.broadcast %4 : vector<1x128xf32> to vector<8x128xf32>
    %6 = arith.addf %3, %5 : vector<8x128xf32>
    %cst_7 = arith.constant 0.000000e+00 : f32
    %7 = vector.broadcast %cst_7 : f32 to vector<8x128xf32>
    %8 = arith.maximumf %6, %7 : vector<8x128xf32>
    %9 = arith.truncf %8 : vector<8x128xf32> to vector<8x128xbf16>
    %c0_8 = arith.constant 0 : index
    %c0_9 = arith.constant 0 : index
    %10 = vector.load %arg5[%c0_8, %c0_9] : memref<128x128xbf16, #tpu.memory_space<vmem>>, vector<128x128xbf16>
    %cst_10 = arith.constant dense<0.000000e+00> : vector<8x128xf32>
    %11 = tpu.matmul %9, %10, %cst_10 {dimension_numbers = #tpu.dot_dimension_numbers<[1], [0], [0], [1], [0, 0, 1, 1], [], []>} : vector<8x128xbf16>, vector<128x128xbf16>, vector<8x128xf32> -> vector<8x128xf32>
    %c0_11 = arith.constant 0 : index
    %c0_12 = arith.constant 0 : index
    %12 = vector.load %arg6[%c0_11, %c0_12] : memref<1x128xf32, #tpu.memory_space<vmem>>, vector<1x128xf32>
    %13 = vector.broadcast %12 : vector<1x128xf32> to vector<8x128xf32>
    %14 = arith.addf %11, %13 : vector<8x128xf32>
    %15 = vector.extract_strided_slice %14 {offsets = [0, 0], sizes = [8, 64], strides = [1, 1]} : vector<8x128xf32> to vector<8x64xf32>
    %16 = vector.extract_strided_slice %14 {offsets = [0, 64], sizes = [8, 64], strides = [1, 1]} : vector<8x128xf32> to vector<8x64xf32>
    %cst_13 = arith.constant 5.000000e-01 : f32
    %17 = vector.broadcast %cst_13 : f32 to vector<8x64xf32>
    %18 = arith.mulf %16, %17 : vector<8x64xf32>
    %19 = math.exp %18 : vector<8x64xf32>
    %20 = arith.mulf %1, %19 : vector<8x64xf32>
    %21 = arith.addf %15, %20 : vector<8x64xf32>
    %22 = arith.truncf %21 : vector<8x64xf32> to vector<8x64xbf16>
    %c0_14 = arith.constant 0 : index
    %c0_15 = arith.constant 0 : index
    %23 = vector.load %arg7[%c0_14, %c0_15] : memref<64x128xbf16, #tpu.memory_space<vmem>>, vector<64x128xbf16>
    %cst_16 = arith.constant dense<0.000000e+00> : vector<8x128xf32>
    %24 = tpu.matmul %22, %23, %cst_16 {dimension_numbers = #tpu.dot_dimension_numbers<[1], [0], [0], [1], [0, 0, 1, 1], [], []>} : vector<8x64xbf16>, vector<64x128xbf16>, vector<8x128xf32> -> vector<8x128xf32>
    %c0_17 = arith.constant 0 : index
    %c0_18 = arith.constant 0 : index
    %25 = vector.load %arg8[%c0_17, %c0_18] : memref<1x128xf32, #tpu.memory_space<vmem>>, vector<1x128xf32>
    %26 = vector.broadcast %25 : vector<1x128xf32> to vector<8x128xf32>
    %27 = arith.addf %24, %26 : vector<8x128xf32>
    %cst_19 = arith.constant 0.000000e+00 : f32
    %28 = vector.broadcast %cst_19 : f32 to vector<8x128xf32>
    %29 = arith.maximumf %27, %28 : vector<8x128xf32>
    %30 = arith.truncf %29 : vector<8x128xf32> to vector<8x128xbf16>
    %c0_20 = arith.constant 0 : index
    %c0_21 = arith.constant 0 : index
    %31 = vector.load %arg9[%c0_20, %c0_21] : memref<128x1024xbf16, #tpu.memory_space<vmem>>, vector<128x1024xbf16>
    %cst_22 = arith.constant dense<0.000000e+00> : vector<8x1024xf32>
    %32 = tpu.matmul %30, %31, %cst_22 {dimension_numbers = #tpu.dot_dimension_numbers<[1], [0], [0], [1], [0, 0, 1, 1], [], []>} : vector<8x128xbf16>, vector<128x1024xbf16>, vector<8x1024xf32> -> vector<8x1024xf32>
    %c0_23 = arith.constant 0 : index
    %c0_24 = arith.constant 0 : index
    %33 = vector.load %arg10[%c0_23, %c0_24] : memref<1x1024xf32, #tpu.memory_space<vmem>>, vector<1x1024xf32>
    %34 = vector.broadcast %33 : vector<1x1024xf32> to vector<8x1024xf32>
    %35 = arith.addf %32, %34 : vector<8x1024xf32>
    %36 = arith.negf %35 : vector<8x1024xf32>
    %37 = math.exp %36 : vector<8x1024xf32>
    %cst_25 = arith.constant 1.000000e+00 : f32
    %38 = vector.broadcast %cst_25 : f32 to vector<8x1024xf32>
    %39 = arith.addf %38, %37 : vector<8x1024xf32>
    %40 = arith.divf %38, %39 : vector<8x1024xf32>
    %c0_26 = arith.constant 0 : index
    %c0_27 = arith.constant 0 : index
    %41 = vector.load %arg11[%c0_26, %c0_27] : memref<8x1024xf32, #tpu.memory_space<vmem>>, vector<8x1024xf32>
    tpu.vector_store %arg11[%c0_26, %c0_27], %40 {strides = array<i32>} : memref<8x1024xf32, #tpu.memory_space<vmem>>, vector<8x1024xf32>,
    %c0_28 = arith.constant 0 : index
    %c0_29 = arith.constant 0 : index
    %42 = vector.load %arg12[%c0_28, %c0_29] : memref<8x128xf32, #tpu.memory_space<vmem>>, vector<8x128xf32>
    tpu.vector_store %arg12[%c0_28, %c0_29], %14 {strides = array<i32>} : memref<8x128xf32, #tpu.memory_space<vmem>>, vector<8x128xf32>,
    return
  }
  func.func @transform_0(%arg0: i32) -> (i32, i32) {
    %c0_i32 = arith.constant 0 : i32
    %c0_i32_0 = arith.constant 0 : i32
    return %arg0, %c0_i32 : i32, i32
  }
  func.func @transform_1(%arg0: i32) -> (i32, i32) {
    %c0_i32 = arith.constant 0 : i32
    %c0_i32_0 = arith.constant 0 : i32
    return %arg0, %c0_i32 : i32, i32
  }
  func.func @transform_2(%arg0: i32) -> (i32, i32) {
    %c0_i32 = arith.constant 0 : i32
    %c0_i32_0 = arith.constant 0 : i32
    %c0_i32_1 = arith.constant 0 : i32
    return %c0_i32, %c0_i32_0 : i32, i32
  }
  func.func @transform_3(%arg0: i32) -> (i32, i32) {
    %c0_i32 = arith.constant 0 : i32
    %c0_i32_0 = arith.constant 0 : i32
    %c0_i32_1 = arith.constant 0 : i32
    return %c0_i32, %c0_i32_0 : i32, i32
  }
  func.func @transform_4(%arg0: i32) -> (i32, i32) {
    %c0_i32 = arith.constant 0 : i32
    %c0_i32_0 = arith.constant 0 : i32
    %c0_i32_1 = arith.constant 0 : i32
    return %c0_i32, %c0_i32_0 : i32, i32
  }
  func.func @transform_5(%arg0: i32) -> (i32, i32) {
    %c0_i32 = arith.constant 0 : i32
    %c0_i32_0 = arith.constant 0 : i32
    %c0_i32_1 = arith.constant 0 : i32
    return %c0_i32, %c0_i32_0 : i32, i32
  }
  func.func @transform_6(%arg0: i32) -> (i32, i32) {
    %c0_i32 = arith.constant 0 : i32
    %c0_i32_0 = arith.constant 0 : i32
    %c0_i32_1 = arith.constant 0 : i32
    return %c0_i32, %c0_i32_0 : i32, i32
  }
  func.func @transform_7(%arg0: i32) -> (i32, i32) {
    %c0_i32 = arith.constant 0 : i32
    %c0_i32_0 = arith.constant 0 : i32
    %c0_i32_1 = arith.constant 0 : i32
    return %c0_i32, %c0_i32_0 : i32, i32
  }
  func.func @transform_8(%arg0: i32) -> (i32, i32) {
    %c0_i32 = arith.constant 0 : i32
    %c0_i32_0 = arith.constant 0 : i32
    %c0_i32_1 = arith.constant 0 : i32
    return %c0_i32, %c0_i32_0 : i32, i32
  }
  func.func @transform_9(%arg0: i32) -> (i32, i32) {
    %c0_i32 = arith.constant 0 : i32
    %c0_i32_0 = arith.constant 0 : i32
    %c0_i32_1 = arith.constant 0 : i32
    return %c0_i32, %c0_i32_0 : i32, i32
  }
  func.func @transform_10(%arg0: i32) -> (i32, i32) {
    %c0_i32 = arith.constant 0 : i32
    %c0_i32_0 = arith.constant 0 : i32
    return %arg0, %c0_i32 : i32, i32
  }
  func.func @transform_11(%arg0: i32) -> (i32, i32) {
    %c0_i32 = arith.constant 0 : i32
    %c0_i32_0 = arith.constant 0 : i32
    return %arg0, %c0_i32 : i32, i32
  }
}

</mosaic_0001>

<bundles_post_ra>
// kernel: vae_forward.1
= control target key start
LH: loop header
LB: loop body
LE: loop exit
PB: predicated region body
PF: predicated region fallthrough
CT: control target
= control target key end

     0   :  { %s2261_s23 = smov 64   ;;  %vm820_vm0 = vcmask 523264   ;;  %s3053_s2 = inlined_call_operand.vmem [shape: bf16[1024,128], index: 2, kind: input, shape index: {}]   ;;  %s3054_s3 = inlined_call_operand.vmem [shape: f32[1,128], index: 3, kind: input, shape index: {}]   ;;  %s3055_s0 = inlined_call_operand.vmem [shape: bf16[8,1024], index: 0, kind: input, shape index: {}]   ;;  %s3056_s5 = inlined_call_operand.vmem [shape: f32[1,128], index: 5, kind: input, shape index: {}]   ;;  %s3057_s4 = inlined_call_operand.vmem [shape: bf16[128,128], index: 4, kind: input, shape index: {}]   ;;  %s3058_s6 = inlined_call_operand.vmem [shape: bf16[64,128], index: 6, kind: input, shape index: {}]   ;;  %s3059_s11 = inlined_call_operand.vmem [shape: f32[8,128], index: 11, kind: output, shape index: {1}]   ;;  %s3060_s7 = inlined_call_operand.vmem [shape: f32[1,128], index: 7, kind: input, shape index: {}]   ;;  %s3061_s8 = inlined_call_operand.vmem [shape: bf16[128,1024], index: 8, kind: input, shape index: {}]   ;;  %s3062_s1 = inlined_call_operand.vmem [shape: f32[8,64], index: 1, kind: input, shape index: {}]   ;;  %s3063_s9 = inlined_call_operand.vmem [shape: f32[1,1024], index: 9, kind: input, shape index: {}]   ;;  %s3064_s10 = inlined_call_operand.vmem [shape: f32[8,1024], index: 10, kind: output, shape index: {0}]  }
   0x1   :  { %v2090_v0 = vld [vmem:[%s3053_s2 + $0x38] sm:$0xff]  ;;  %v2089_v4 = vld [vmem:[%s3053_s2 + $0x30] sm:$0xff]  ;;  %v2088_v8 = vld [vmem:[%s3053_s2 + $0x28] sm:$0xff] }
   0x2   :  { %v2098_v1 = vld [vmem:[%s3053_s2 + $0x78] sm:$0xff]  ;;  %587 = vmatpush.bf16.msra.mxu0 %v2090_v0  ;;  %v2097_v5 = vld [vmem:[%s3053_s2 + $0x70] sm:$0xff]  ;;  %v2096_v9 = vld [vmem:[%s3053_s2 + $0x68] sm:$0xff] }
   0x3   :  { %v2106_v2 = vld [vmem:[%s3053_s2 + $0xb8] sm:$0xff]  ;;  %600 = vmatpush.bf16.msra.mxu1 %v2098_v1  ;;  %v2105_v6 = vld [vmem:[%s3053_s2 + $0xb0] sm:$0xff]  ;;  %v2104_v10 = vld [vmem:[%s3053_s2 + $0xa8] sm:$0xff] }
   0x4   :  { %v2114_v3 = vld [vmem:[%s3053_s2 + $0xf8] sm:$0xff]  ;;  %613 = vmatpush.bf16.msra.mxu2 %v2106_v2  ;;  %v2113_v7 = vld [vmem:[%s3053_s2 + $0xf0] sm:$0xff]  ;;  %v2112_v11 = vld [vmem:[%s3053_s2 + $0xe8] sm:$0xff] }
   0x5   :  { %626 = vmatpush.bf16.msra.mxu3 %v2114_v3  ;;  %v2087_v12 = vld [vmem:[%s3053_s2 + $0x20] sm:$0xff]  ;;  %v2086_v16 = vld [vmem:[%s3053_s2 + $0x18] sm:$0xff]  ;;  %v2085_v20 = vld [vmem:[%s3053_s2 + $0x10] sm:$0xff] }
   0x6   :  { %588 = vmatpush.bf16.msra.mxu0 %v2089_v4  ;;  %v2095_v13 = vld [vmem:[%s3053_s2 + $0x60] sm:$0xff]  ;;  %v2094_v17 = vld [vmem:[%s3053_s2 + $0x58] sm:$0xff]  ;;  %v2093_v21 = vld [vmem:[%s3053_s2 + $0x50] sm:$0xff] }
   0x7   :  { %601 = vmatpush.bf16.msra.mxu1 %v2097_v5  ;;  %v2103_v14 = vld [vmem:[%s3053_s2 + $0xa0] sm:$0xff]  ;;  %v2102_v18 = vld [vmem:[%s3053_s2 + $0x98] sm:$0xff]  ;;  %v2101_v22 = vld [vmem:[%s3053_s2 + $0x90] sm:$0xff] }
   0x8   :  { %614 = vmatpush.bf16.msra.mxu2 %v2105_v6  ;;  %v2111_v15 = vld [vmem:[%s3053_s2 + $0xe0] sm:$0xff]  ;;  %v2110_v19 = vld [vmem:[%s3053_s2 + $0xd8] sm:$0xff]  ;;  %v2109_v23 = vld [vmem:[%s3053_s2 + $0xd0] sm:$0xff] }
   0x9   :  { %627 = vmatpush.bf16.msra.mxu3 %v2113_v7  ;;  %v2084_v24 = vld [vmem:[%s3053_s2 + $0x8] sm:$0xff]  ;;  %v38_v29 = vld [vmem:[%s3055_s0] sm:$0xff]  ;;  %v2122_v38 = vld [vmem:[%s3053_s2 + $0x138] sm:$0xff] }
   0xa   :  { %589 = vmatpush.bf16.msra.mxu0 %v2088_v8  ;;  %v2092_v25 = vld [vmem:[%s3053_s2 + $0x48] sm:$0xff]  ;;  %v2083_v30 = vld [vmem:[%s3053_s2] sm:$0xff]  ;;  %v179_v33 = vunpack.c.l.b16 %v38_v29  ;;  %v180_v37 = vunpack.c.h.b16 %v38_v29  ;;  %v2130_v39 = vld [vmem:[%s3053_s2 + $0x178] sm:$0xff] }
   0xb   :  { %602 = vmatpush.bf16.msra.mxu1 %v2096_v9  ;;  %v2100_v26 = vld [vmem:[%s3053_s2 + $0x88] sm:$0xff]  ;;  %v2091_v31 = vld [vmem:[%s3053_s2 + $0x40] sm:$0xff]  ;;  %v2138_v40 = vld [vmem:[%s3053_s2 + $0x1b8] sm:$0xff] }
   0xc   :  { %615 = vmatpush.bf16.msra.mxu2 %v2104_v10  ;;  %v2108_v27 = vld [vmem:[%s3053_s2 + $0xc8] sm:$0xff]  ;;  %v2099_v34 = vld [vmem:[%s3053_s2 + $0x80] sm:$0xff]  ;;  %v2146_v41 = vld [vmem:[%s3053_s2 + $0x1f8] sm:$0xff]  ;;  %v187_v43 = vpack.c.b16 %v179_v33, %v179_v33  ;;  %v188_v45 = vpack.c.b16 %v180_v37, %v180_v37 }
   0xd   :  { %628 = vmatpush.bf16.msra.mxu3 %v2112_v11  ;;  %v39_v28 = vld [vmem:[%s3055_s0 + $0x8] sm:$0xff]  ;;  %v2107_v35 = vld [vmem:[%s3053_s2 + $0xc0] sm:$0xff]  ;;  %v2121_v46 = vld [vmem:[%s3053_s2 + $0x130] sm:$0xff] }
   0xe   :  { %590 = vmatpush.bf16.msra.mxu0 %v2087_v12  ;;  %v181_v32 = vunpack.c.l.b16 %v39_v28  ;;  %v182_v36 = vunpack.c.h.b16 %v39_v28  ;;  %v2129_v47 = vld [vmem:[%s3053_s2 + $0x170] sm:$0xff]  ;;  %v2120_v50 = vld [vmem:[%s3053_s2 + $0x128] sm:$0xff]  ;;  %v2119_v54 = vld [vmem:[%s3053_s2 + $0x120] sm:$0xff] }
   0xf   :  { %603 = vmatpush.bf16.msra.mxu1 %v2095_v13  ;;  %v2137_v48 = vld [vmem:[%s3053_s2 + $0x1b0] sm:$0xff]  ;;  %v2128_v51 = vld [vmem:[%s3053_s2 + $0x168] sm:$0xff]  ;;  %v2127_v55 = vld [vmem:[%s3053_s2 + $0x160] sm:$0xff] }
  0x10   :  { %616 = vmatpush.bf16.msra.mxu2 %v2103_v14  ;;  %v189_v42 = vpack.c.b16 %v181_v32, %v181_v32  ;;  %v190_v44 = vpack.c.b16 %v182_v36, %v182_v36  ;;  %v2145_v49 = vld [vmem:[%s3053_s2 + $0x1f0] sm:$0xff]  ;;  %v2136_v52 = vld [vmem:[%s3053_s2 + $0x1a8] sm:$0xff]  ;;  %v2135_v56 = vld [vmem:[%s3053_s2 + $0x1a0] sm:$0xff] }
  0x11   :  { %629 = vmatpush.bf16.msra.mxu3 %v2111_v15  ;;  %v2144_v53 = vld [vmem:[%s3053_s2 + $0x1e8] sm:$0xff]  ;;  %v2143_v57 = vld [vmem:[%s3053_s2 + $0x1e0] sm:$0xff]  ;;  %v2118_v58 = vld [vmem:[%s3053_s2 + $0x118] sm:$0xff] }
  0x12   :  { %591 = vmatpush.bf16.msra.mxu0 %v2086_v16  ;;  %v2126_v59 = vld [vmem:[%s3053_s2 + $0x158] sm:$0xff]  ;;  %v2117_v62 = vld [vmem:[%s3053_s2 + $0x110] sm:$0xff]  ;;  %v2116_v2 = vld [vmem:[%s3053_s2 + $0x108] sm:$0xff] }
  0x13   :  { %604 = vmatpush.bf16.msra.mxu1 %v2094_v17  ;;  %v2134_v60 = vld [vmem:[%s3053_s2 + $0x198] sm:$0xff]  ;;  %v2125_v63 = vld [vmem:[%s3053_s2 + $0x150] sm:$0xff]  ;;  %v2124_v3 = vld [vmem:[%s3053_s2 + $0x148] sm:$0xff] }
  0x14   :  { %617 = vmatpush.bf16.msra.mxu2 %v2102_v18  ;;  %v2142_v61 = vld [vmem:[%s3053_s2 + $0x1d8] sm:$0xff]  ;;  %v2133_v0 = vld [vmem:[%s3053_s2 + $0x190] sm:$0xff]  ;;  %v2132_v5 = vld [vmem:[%s3053_s2 + $0x188] sm:$0xff] }
  0x15   :  { %630 = vmatpush.bf16.msra.mxu3 %v2110_v19  ;;  %v2141_v1 = vld [vmem:[%s3053_s2 + $0x1d0] sm:$0xff]  ;;  %v2140_v6 = vld [vmem:[%s3053_s2 + $0x1c8] sm:$0xff]  ;;  %v41_v7 = vld [vmem:[%s3055_s0 + $0x18] sm:$0xff] }
  0x16   :  { %592 = vmatpush.bf16.msra.mxu0 %v2085_v20  ;;  %v40_v4 = vld [vmem:[%s3055_s0 + $0x10] sm:$0xff]  ;;  %v2115_v10 = vld [vmem:[%s3053_s2 + $0x100] sm:$0xff]  ;;  %v185_v12 = vunpack.c.l.b16 %v41_v7  ;;  %v186_v13 = vunpack.c.h.b16 %v41_v7  ;;  %v2154_v20 = vld [vmem:[%s3057_s4 + $0x38] sm:$0xff] }
  0x17   :  { %605 = vmatpush.bf16.msra.mxu1 %v2093_v21  ;;  %v183_v8 = vunpack.c.l.b16 %v40_v4  ;;  %v184_v9 = vunpack.c.h.b16 %v40_v4  ;;  %v2123_v11 = vld [vmem:[%s3053_s2 + $0x140] sm:$0xff]  ;;  %v2153_v21 = vld [vmem:[%s3057_s4 + $0x30] sm:$0xff]  ;;  %v2148_v28 = vld [vmem:[%s3057_s4 + $0x8] sm:$0xff] }
  0x18   :  { %618 = vmatpush.bf16.msra.mxu2 %v2101_v22  ;;  %v2131_v14 = vld [vmem:[%s3053_s2 + $0x180] sm:$0xff]  ;;  %v193_v18 = vpack.c.b16 %v185_v12, %v185_v12  ;;  %v194_v19 = vpack.c.b16 %v186_v13, %v186_v13  ;;  %v2152_v22 = vld [vmem:[%s3057_s4 + $0x28] sm:$0xff] }
  0x19   :  { %631 = vmatpush.bf16.msra.mxu3 %v2109_v23  ;;  %v2139_v15 = vld [vmem:[%s3053_s2 + $0x1c0] sm:$0xff]  ;;  %v191_v16 = vpack.c.b16 %v183_v8, %v183_v8  ;;  %v192_v17 = vpack.c.b16 %v184_v9, %v184_v9  ;;  %v2053_v7 = vld [vmem:[%s3061_s8 + $0x1c8] sm:$0xf]  ;;  %v2055_v12 = vld [vmem:[%s3061_s8 + $0x1e8] sm:$0xf0] }
  0x1a   :  { %593 = vmatpush.bf16.msra.mxu0 %v2084_v24  ;;  %v2151_v23 = vld [vmem:[%s3057_s4 + $0x20] sm:$0xff]  ;;  %v2150_v24 = vld [vmem:[%s3057_s4 + $0x18] sm:$0xff]  ;;  %v2220_v8 = vld [vmem:[%s3061_s8 + $0x1e4] sm:$0xf0] }
  0x1b   :  { %606 = vmatpush.bf16.msra.mxu1 %v2092_v25  ;;  %v2147_v32 = vld [vmem:[%s3057_s4] sm:$0xff] }
  0x1c   :  { %619 = vmatpush.bf16.msra.mxu2 %v2100_v26  ;;  %v2149_v26 = vld [vmem:[%s3057_s4 + $0x10] sm:$0xff]  ;;  %v2215_v4 = vld [vmem:[%s3061_s8 + $0x1c4] sm:$0xf]  ;;  %v2013_v13 = vld [vmem:[%s3061_s8 + $0x180] sm:$0xf] }
  0x1d   :  { %632 = vmatpush.bf16.msra.mxu3 %v2108_v27 }
  0x1e   :  { %594 = vmatpush.bf16.msra.mxu0 %v2083_v30 }
  0x1f   :  { %607 = vmatpush.bf16.msra.mxu1 %v2091_v31 }
  0x20   :  { %620 = vmatpush.bf16.msra.mxu2 %v2099_v34  ;;  %v2224_v34 = vld [vmem:[%s3054_s3] ss:$0 sm:$0xff] }
  0x21   :  { %633 = vmatpush.bf16.msra.mxu3 %v2107_v35  ;;  %595 = vmatmul.bf16.vlgmr.msra.gmra.mxu0 %v187_v43 }
  0x22   :  { %639 = vmatpush.bf16.msrb.mxu0 %v2122_v38  ;;  %608 = vmatmul.bf16.vlgmr.msra.gmra.mxu1 %v188_v45 }
  0x23   :  { %652 = vmatpush.bf16.msrb.mxu1 %v2130_v39  ;;  %621 = vmatmul.bf16.vlgmr.msra.gmra.mxu2 %v189_v42 }
  0x24   :  { %665 = vmatpush.bf16.msrb.mxu2 %v2138_v40  ;;  %634 = vmatmul.bf16.vlgmr.msra.gmra.mxu3 %v190_v44 }
  0x25   :  { %678 = vmatpush.bf16.msrb.mxu3 %v2146_v41 }
  0x26   :  { %640 = vmatpush.bf16.msrb.mxu0 %v2121_v46 }
  0x27   :  { %653 = vmatpush.bf16.msrb.mxu1 %v2129_v47 }
  0x28   :  { %666 = vmatpush.bf16.msrb.mxu2 %v2137_v48 }
  0x29   :  { %679 = vmatpush.bf16.msrb.mxu3 %v2145_v49 }
  0x2a   :  { %641 = vmatpush.bf16.msrb.mxu0 %v2120_v50 }
  0x2b   :  { %654 = vmatpush.bf16.msrb.mxu1 %v2128_v51 }
  0x2c   :  { %667 = vmatpush.bf16.msrb.mxu2 %v2136_v52 }
  0x2d   :  { %680 = vmatpush.bf16.msrb.mxu3 %v2144_v53 }
  0x2e   :  { %642 = vmatpush.bf16.msrb.mxu0 %v2119_v54 }
  0x2f   :  { %655 = vmatpush.bf16.msrb.mxu1 %v2127_v55  ;;  %v2158_v55 = vld [vmem:[%s3058_s6 + $0x18] sm:$0xff] }
  0x30   :  { %668 = vmatpush.bf16.msrb.mxu2 %v2135_v56  ;;  %v2157_v56 = vld [vmem:[%s3058_s6 + $0x10] sm:$0xff] }
  0x31   :  { %681 = vmatpush.bf16.msrb.mxu3 %v2143_v57  ;;  %v2156_v57 = vld [vmem:[%s3058_s6 + $0x8] sm:$0xff] }
  0x32   :  { %643 = vmatpush.bf16.msrb.mxu0 %v2118_v58  ;;  %v2225_v58 = vld [vmem:[%s3056_s5] ss:$0 sm:$0xff] }
  0x33   :  { %656 = vmatpush.bf16.msrb.mxu1 %v2126_v59 }
  0x34   :  { %669 = vmatpush.bf16.msrb.mxu2 %v2134_v60 }
  0x35   :  { %682 = vmatpush.bf16.msrb.mxu3 %v2142_v61 }
  0x36   :  { %644 = vmatpush.bf16.msrb.mxu0 %v2117_v62 }
  0x37   :  { %657 = vmatpush.bf16.msrb.mxu1 %v2125_v63 }
  0x38   :  { %670 = vmatpush.bf16.msrb.mxu2 %v2133_v0 }
  0x39   :  { %683 = vmatpush.bf16.msrb.mxu3 %v2141_v1  ;;  %v2155_v1 = vld [vmem:[%s3058_s6] sm:$0xff] }
  0x3a   :  { %645 = vmatpush.bf16.msrb.mxu0 %v2116_v2  ;;  %v2045_v2 = vld [vmem:[%s3061_s8 + $0x1c0] sm:$0xf] }
  0x3b   :  { %658 = vmatpush.bf16.msrb.mxu1 %v2124_v3  ;;  %v2219_v3 = vld [vmem:[%s3061_s8 + $0x1dc] sm:$0xf0] }
  0x3c   :  { %671 = vmatpush.bf16.msrb.mxu2 %v2132_v5  ;;  %v2046_v5 = vor.u32 %v2219_v3, %v2045_v2  ;;  %v1887_v2 = vld [vmem:[%s3061_s8 + $0xa0] sm:$0xf0]  ;;  %v1893_v3 = vld [vmem:[%s3061_s8 + $0x88] sm:$0xf] }
  0x3d   :  { %684 = vmatpush.bf16.msrb.mxu3 %v2140_v6  ;;  %v2047_v6 = vld [vmem:[%s3061_s8 + $0x1e0] sm:$0xf0] }
  0x3e   :  { %646 = vmatpush.bf16.msrb.mxu0 %v2115_v10  ;;  %v2050_v9 = vor.u32 %v2215_v4, %v2047_v6  ;;  %v2054_v10 = vor.u32 %v2220_v8, %v2053_v7  ;;  %v2180_v4 = vld [vmem:[%s3061_s8 + $0xa4] sm:$0xf0]  ;;  %v1895_v6 = vld [vmem:[%s3061_s8 + $0xa8] sm:$0xf0] }
  0x3f   :  { %659 = vmatpush.bf16.msrb.mxu1 %v2123_v11  ;;  %v2216_v11 = vld [vmem:[%s3061_s8 + $0x1cc] sm:$0xf] }
  0x40   :  { %672 = vmatpush.bf16.msrb.mxu2 %v2131_v14  ;;  %v2058_v14 = vor.u32 %v2216_v11, %v2055_v12  ;;  %v2171_v11 = vld [vmem:[%s3061_s8 + $0x5c] sm:$0xf0]  ;;  %v2167_v12 = vld [vmem:[%s3061_s8 + $0x44] sm:$0xf] }
  0x41   :  { %685 = vmatpush.bf16.msrb.mxu3 %v2139_v15  ;;  %647 = vmatmul.bf16.vlgmr.msrb.gmra.mxu0 %v191_v16  ;;  %v2211_v15 = vld [vmem:[%s3061_s8 + $0x19c] sm:$0xf0]  ;;  %v2207_v16 = vld [vmem:[%s3061_s8 + $0x184] sm:$0xf] }
  0x42   :  { %660 = vmatmul.bf16.vlgmr.msrb.gmra.mxu1 %v192_v17  ;;  %761 = vmatpush.bf16.msra.mxu0 %v2154_v20  ;;  %v2015_v17 = vld [vmem:[%s3061_s8 + $0x1a0] sm:$0xf0]  ;;  %v2021_v20 = vld [vmem:[%s3061_s8 + $0x188] sm:$0xf] }
  0x43   :  { %673 = vmatmul.bf16.vlgmr.msrb.gmra.mxu2 %v193_v18  ;;  %828 = vmatpush.bf16.msra.mxu1 %v2158_v55  ;;  %v2014_v18 = vor.u32 %v2211_v15, %v2013_v13  ;;  %v2188_v55 = vld [vmem:[%s3061_s8 + $0xe4] sm:$0xf0] }
  0x44   :  { %686 = vmatmul.bf16.vlgmr.msrb.gmra.mxu3 %v194_v19  ;;  %1241 = vmatpush.bf16.msra.mxu2 %v2046_v5  ;;  %v2018_v19 = vor.u32 %v2207_v16, %v2015_v17  ;;  %v2176_v5 = vld [vmem:[%s3061_s8 + $0x8c] sm:$0xf]  ;;  %v1861_v15 = vld [vmem:[%s3061_s8 + $0x48] sm:$0xf] }
  0x45   :  { %1254 = vmatpush.bf16.msra.mxu3 %v2050_v9  ;;  %v1894_v9 = vor.u32 %v2180_v4, %v1893_v3  ;;  %v1898_v13 = vor.u32 %v2176_v5, %v1895_v6  ;;  %v2172_v16 = vld [vmem:[%s3061_s8 + $0x64] sm:$0xf0]  ;;  %v2168_v17 = vld [vmem:[%s3061_s8 + $0x4c] sm:$0xf]  ;;  %v1999_v4 = vld [vmem:[%s3061_s8 + $0x170] sm:$0xf0] }
  0x46   :  { %762 = vmatpush.bf16.msra.mxu0 %v2153_v21  ;;  %v2212_v21 = vld [vmem:[%s3061_s8 + $0x1a4] sm:$0xf0]  ;;  %v2005_v5 = vld [vmem:[%s3061_s8 + $0x158] sm:$0xf] }
  0x47   :  { %829 = vmatpush.bf16.msra.mxu1 %v2157_v56  ;;  %v2184_v56 = vld [vmem:[%s3061_s8 + $0xcc] sm:$0xf]  ;;  %v2206_v6 = vld [vmem:[%s3061_s8 + $0x174] sm:$0xf0] }
  0x48   :  { %1242 = vmatpush.bf16.msra.mxu2 %v2014_v18  ;;  %v1863_v18 = vld [vmem:[%s3061_s8 + $0x68] sm:$0xf0] }
  0x49   :  { %1255 = vmatpush.bf16.msra.mxu3 %v2018_v19  ;;  %v42_v19 = vld [vmem:[%s3062_s1] sm:$0xff] }
  0x4a   :  { %763 = vmatpush.bf16.msra.mxu0 %v2152_v22  ;;  %v2208_v22 = vld [vmem:[%s3061_s8 + $0x18c] sm:$0xf] }
  0x4b   :  { %830 = vmatpush.bf16.msra.mxu1 %v2156_v57  ;;  %v1927_v57 = vld [vmem:[%s3061_s8 + $0xe8] sm:$0xf0] }
  0x4e   :  { %764 = vmatpush.bf16.msra.mxu0 %v2151_v23  ;;  %v2022_v23 = vor.u32 %v2212_v21, %v2021_v20  ;;  %v1821_v21 = vld [vmem:[%s3061_s8] sm:$0xf] }
  0x4f   :  { %831 = vmatpush.bf16.msra.mxu1 %v2155_v1  ;;  %v1930_v1 = vor.u32 %v2184_v56, %v1927_v57  ;;  %v2214_v56 = vld [vmem:[%s3061_s8 + $0x1b4] sm:$0xf0]  ;;  %v2210_v57 = vld [vmem:[%s3061_s8 + $0x19c] sm:$0xf] }
  0x52   :  { %765 = vmatpush.bf16.msra.mxu0 %v2150_v24  ;;  %v2023_v24 = vld [vmem:[%s3061_s8 + $0x1a8] sm:$0xf0] }
  0x53   :  { %1267 = vmatpush.bf16.msrb.mxu1 %v2054_v10  ;;  %v1853_v10 = vld [vmem:[%s3061_s8 + $0x40] sm:$0xf] }
  0x54   :  { %v1854_v20 = vor.u32 %v2171_v11, %v1853_v10  ;;  %v2007_v10 = vld [vmem:[%s3061_s8 + $0x178] sm:$0xf0] }
  0x56   :  { %766 = vmatpush.bf16.msra.mxu0 %v2149_v26  ;;  %v2203_v26 = vld [vmem:[%s3061_s8 + $0x15c] sm:$0xf0] }
  0x57   :  { %1268 = vmatpush.bf16.msrb.mxu1 %v2022_v23  ;;  %v1862_v23 = vor.u32 %v2172_v16, %v1861_v15  ;;  %v1967_v16 = vld [vmem:[%s3061_s8 + $0x130] sm:$0xf0] }
  0x5a   :  { %767 = vmatpush.bf16.msra.mxu0 %v2148_v28  ;;  %v2199_v28 = vld [vmem:[%s3061_s8 + $0x144] sm:$0xf] }
  0x5e   :  { %768 = vmatpush.bf16.msra.mxu0 %v2147_v32  ;;  %v2204_v32 = vld [vmem:[%s3061_s8 + $0x164] sm:$0xf0] }
  0x62   :  { %1280 = vmatpush.bf16.msrb.mxu0 %v2058_v14  ;;  %v1855_v14 = vld [vmem:[%s3061_s8 + $0x60] sm:$0xf0] }
  0x9e   :  { %v596_v25 = vpop.f32.mrf.mxu0 }
  0x9f   :  { %v609_v27 = vpop.f32.mrf.mxu1  ;;  %v597_v37 = vadd.f32 %v2224_v34, %v596_v25  ;;  %v1981_v25 = vld [vmem:[%s3061_s8 + $0x140] sm:$0xf]  ;;  %v1991_v34 = vld [vmem:[%s3061_s8 + $0x168] sm:$0xf0] }
  0xa1   :  { %v610_v38 = vadd.f32 %v609_v27, %v597_v37  ;;  %v2026_v27 = vor.u32 %v2208_v22, %v2023_v24  ;;  %v1949_v37 = vld [vmem:[%s3061_s8 + $0x100] sm:$0xf]  ;;  %v1858_v22 = vor.u32 %v2167_v12, %v1855_v14  ;;  %v1965_v12 = vld [vmem:[%s3061_s8 + $0x110] sm:$0xf]  ;;  %v2193_v14 = vld [vmem:[%s3061_s8 + $0x114] sm:$0xf] }
  0xa2   :  { %v2163_v24 = vld [vmem:[%s3061_s8 + $0x1c] sm:$0xf0] }
  0xa3   :  { %1281 = vmatpush.bf16.msrb.mxu0 %v2026_v27 }
  0xa6   :  { %v622_v29 = vpop.f32.mrf.mxu2  ;;  %v598_v31 = vpop.f32.mrf.mxu0 }
  0xa7   :  { %v635_v30 = vpop.f32.mrf.mxu3  ;;  %v611_v33 = vpop.f32.mrf.mxu1  ;;  %v623_v39 = vadd.f32 %v622_v29, %v610_v38  ;;  %v1983_v29 = vld [vmem:[%s3061_s8 + $0x160] sm:$0xf0]  ;;  %v1982_v31 = vor.u32 %v2203_v26, %v1981_v25  ;;  %v2195_v38 = vld [vmem:[%s3061_s8 + $0x11c] sm:$0xf0] }
  0xa8   :  { %v2200_v33 = vld [vmem:[%s3061_s8 + $0x14c] sm:$0xf]  ;;  %v2159_v25 = vld [vmem:[%s3061_s8 + $0x4] sm:$0xf] }
  0xa9   :  { %v636_v40 = vadd.f32 %v635_v30, %v623_v39  ;;  %v1989_v30 = vld [vmem:[%s3061_s8 + $0x148] sm:$0xf]  ;;  %v2191_v39 = vld [vmem:[%s3061_s8 + $0x104] sm:$0xf]  ;;  %1243 = vmatpush.bf16.msra.mxu2 %v1982_v31  ;;  %v2160_v31 = vld [vmem:[%s3061_s8 + $0xc] sm:$0xf] }
  0xaa   :  { %v1823_v26 = vld [vmem:[%s3061_s8 + $0x20] sm:$0xf0] }
  0xae   :  { %v624_v35 = vpop.f32.mrf.mxu2 }
  0xaf   :  { %v637_v36 = vpop.f32.mrf.mxu3  ;;  %v1986_v35 = vor.u32 %v2199_v28, %v1983_v29  ;;  %v1866_v28 = vor.u32 %v2168_v17, %v1863_v18  ;;  %v1829_v29 = vld [vmem:[%s3061_s8 + $0x8] sm:$0xf]  ;;  %v1973_v17 = vld [vmem:[%s3061_s8 + $0x118] sm:$0xf] }
  0xb0   :  { %v1990_v36 = vor.u32 %v2204_v32, %v1989_v30  ;;  %v2164_v30 = vld [vmem:[%s3061_s8 + $0x24] sm:$0xf0]  ;;  %v2198_v18 = vld [vmem:[%s3061_s8 + $0x134] sm:$0xf0] }
  0xb1   :  { %1256 = vmatpush.bf16.msra.mxu3 %v1986_v35  ;;  %v2221_v35 = vld [vmem:[%s3061_s8 + $0x1ec] sm:$0xf0] }
  0xb2   :  { %1269 = vmatpush.bf16.msrb.mxu1 %v1990_v36  ;;  %v1822_v36 = vor.u32 %v2163_v24, %v1821_v21  ;;  %v2194_v21 = vld [vmem:[%s3061_s8 + $0x11c] sm:$0xf]  ;;  %v1933_v24 = vld [vmem:[%s3061_s8 + $0xd0] sm:$0xf] }
  0xbe   :  { %v648_v41 = vpop.f32.mrf.mxu0 }
  0xbf   :  { %v661_v42 = vpop.f32.mrf.mxu1  ;;  %v649_v43 = vadd.f32 %v648_v41, %v636_v40  ;;  %v1994_v40 = vor.u32 %v2200_v33, %v1991_v34  ;;  %v1951_v41 = vld [vmem:[%s3061_s8 + $0x120] sm:$0xf0]  ;;  %v1831_v33 = vld [vmem:[%s3061_s8 + $0x28] sm:$0xf0]  ;;  %v2061_v34 = vld [vmem:[%s3061_s8 + $0x1d0] sm:$0xf] }
  0xc1   :  { %v662_v44 = vadd.f32 %v661_v42, %v649_v43  ;;  %v1957_v42 = vld [vmem:[%s3061_s8 + $0x108] sm:$0xf]  ;;  %1282 = vmatpush.bf16.msrb.mxu0 %v1994_v40 }
  0xc2   :  { %v2196_v43 = vld [vmem:[%s3061_s8 + $0x124] sm:$0xf0] }
  0xc6   :  { %v674_v45 = vpop.f32.mrf.mxu2  ;;  %v650_v48 = vpop.f32.mrf.mxu0 }
  0xc7   :  { %v687_v46 = vpop.f32.mrf.mxu3  ;;  %v675_v47 = vadd.f32 %v674_v45, %v662_v44  ;;  %v663_v49 = vpop.f32.mrf.mxu1  ;;  %v2192_v44 = vld [vmem:[%s3061_s8 + $0x10c] sm:$0xf]  ;;  %v1958_v48 = vor.u32 %v2196_v43, %v1957_v42  ;;  %v2222_v42 = vld [vmem:[%s3061_s8 + $0x1f4] sm:$0xf0]  ;;  %v2218_v43 = vld [vmem:[%s3061_s8 + $0x1dc] sm:$0xf] }
  0xc8   :  { %v1959_v45 = vld [vmem:[%s3061_s8 + $0x128] sm:$0xf0]  ;;  %v1917_v49 = vld [vmem:[%s3061_s8 + $0xc0] sm:$0xf] }
  0xc9   :  { %v688_v50 = vadd.f32 %v687_v46, %v675_v47  ;;  %v1950_v46 = vor.u32 %v2195_v38, %v1949_v37  ;;  %v1954_v47 = vor.u32 %v2191_v39, %v1951_v41  ;;  %1270 = vmatpush.bf16.msrb.mxu1 %v1958_v48  ;;  %v2217_v37 = vld [vmem:[%s3061_s8 + $0x1d4] sm:$0xf]  ;;  %v2069_v39 = vld [vmem:[%s3061_s8 + $0x1d8] sm:$0xf]  ;;  %v1826_v41 = vor.u32 %v2159_v25, %v1823_v26  ;;  %v2189_v25 = vld [vmem:[%s3061_s8 + $0xec] sm:$0xf0] }
  0xca   :  { %v2063_v38 = vld [vmem:[%s3061_s8 + $0x1f0] sm:$0xf0] }
  0xcb   :  { %v691_v51 = vmax.f32 %v688_v50, 0.0  ;;  %v2187_v50 = vld [vmem:[%s3061_s8 + $0xdc] sm:$0xf0]  ;;  %1244 = vmatpush.bf16.msra.mxu2 %v1950_v46  ;;  %1257 = vmatpush.bf16.msra.mxu3 %v1954_v47  ;;  %v1834_v46 = vor.u32 %v2160_v31, %v1831_v33  ;;  %v2062_v47 = vor.u32 %v2221_v35, %v2061_v34  ;;  %v2066_v48 = vor.u32 %v2217_v37, %v2063_v38  ;;  %v2185_v26 = vld [vmem:[%s3061_s8 + $0xd4] sm:$0xf] }
  0xcc   :  { %v2186_v33 = vld [vmem:[%s3061_s8 + $0xdc] sm:$0xf]  ;;  %v1901_v35 = vld [vmem:[%s3061_s8 + $0x90] sm:$0xf]  ;;  %v2177_v38 = vld [vmem:[%s3061_s8 + $0x94] sm:$0xf] }
  0xcd   :  { %v692_v52 = vpack.c.bf16 %v691_v51, %v691_v51  ;;  %v2183_v51 = vld [vmem:[%s3061_s8 + $0xc4] sm:$0xf]  ;;  %v1943_v34 = vld [vmem:[%s3061_s8 + $0xf8] sm:$0xf0]  ;;  %v2181_v37 = vld [vmem:[%s3061_s8 + $0xac] sm:$0xf0] }
  0xce   :  { %v676_v53 = vpop.f32.mrf.mxu2 }
  0xcf   :  { %v689_v54 = vpop.f32.mrf.mxu3  ;;  %769 = vmatmul.bf16.vlgmr.msra.gmra.mxu0 %v692_v52  ;;  %v1962_v52 = vor.u32 %v2192_v44, %v1959_v45  ;;  %v1919_v53 = vld [vmem:[%s3061_s8 + $0xe0] sm:$0xf0]  ;;  %v2071_v44 = vld [vmem:[%s3061_s8 + $0x1f8] sm:$0xf0]  ;;  %v1830_v45 = vor.u32 %v2164_v30, %v1829_v29  ;;  %v1941_v29 = vld [vmem:[%s3061_s8 + $0xd8] sm:$0xf] }
  0xd0   :  { %v1925_v54 = vld [vmem:[%s3061_s8 + $0xc8] sm:$0xf]  ;;  %v2190_v30 = vld [vmem:[%s3061_s8 + $0xf4] sm:$0xf0] }
  0xd1   :  { %1283 = vmatpush.bf16.msrb.mxu0 %v1962_v52  ;;  %v2074_v52 = vor.u32 %v2218_v43, %v2071_v44  ;;  %v2182_v43 = vld [vmem:[%s3061_s8 + $0xb4] sm:$0xf0]  ;;  %v2178_v44 = vld [vmem:[%s3061_s8 + $0x9c] sm:$0xf] }
  0xd5   :  { %1284 = vmatpush.bf16.msrb.mxu0 %v1930_v1  ;;  %v2205_v1 = vld [vmem:[%s3061_s8 + $0x16c] sm:$0xf0] }
  0xd9   :  { %1285 = vmatpush.bf16.msrb.mxu0 %v1898_v13  ;;  %v2197_v13 = vld [vmem:[%s3061_s8 + $0x12c] sm:$0xf0] }
  0xda   :  { %v1966_v15 = vor.u32 %v2197_v13, %v1965_v12 }
  0xdd   :  { %1286 = vmatpush.bf16.msrb.mxu0 %v1866_v28  ;;  %v1935_v28 = vld [vmem:[%s3061_s8 + $0xf0] sm:$0xf0] }
  0xde   :  { %v1938_v31 = vor.u32 %v2185_v26, %v1935_v28 }
  0xe1   :  { %1287 = vmatpush.bf16.msrb.mxu0 %v1834_v46  ;;  %v1911_v46 = vld [vmem:[%s3061_s8 + $0xb8] sm:$0xf0] }
  0xe5   :  { %1332 = vmatpush.bf16.msra.mxu0 %v2074_v52 }
 0x14c   :  { %v770_v59 = vpop.f32.mrf.mxu0 }
 0x14d   :  { %v2565_v60 = vadd.f32 %v2225_v58, %v770_v59  ;;  %v1918_v58 = vor.u32 %v2187_v50, %v1917_v49  ;;  %v1922_v59 = vor.u32 %v2183_v51, %v1919_v53  ;;  %v2029_v49 = vld [vmem:[%s3061_s8 + $0x190] sm:$0xf]  ;;  %v2070_v51 = vor.u32 %v2222_v42, %v2069_v39  ;;  %v2209_v53 = vld [vmem:[%s3061_s8 + $0x194] sm:$0xf]  ;;  %v1909_v42 = vld [vmem:[%s3061_s8 + $0x98] sm:$0xf] }
 0x14e   :  { %v2213_v50 = vld [vmem:[%s3061_s8 + $0x1ac] sm:$0xf0]  ;;  %v1903_v39 = vld [vmem:[%s3061_s8 + $0xb0] sm:$0xf0] }
 0x14f   :  { %v774_v61 = vmul.f32 0.5, %v2565_v60  ;;  %1505 = vst [vmem:[%s3059_s11] sm:$0xff] %v2565_v60  ;;  %1245 = vmatpush.bf16.msra.mxu2 %v1918_v58  ;;  %1258 = vmatpush.bf16.msra.mxu3 %v1922_v59  ;;  %v2039_v58 = vld [vmem:[%s3061_s8 + $0x1b8] sm:$0xf0]  ;;  %v2030_v59 = vor.u32 %v2213_v50, %v2029_v49  ;;  %v2169_v49 = vld [vmem:[%s3061_s8 + $0x54] sm:$0xf] }
 0x150   :  { %v1871_v50 = vld [vmem:[%s3061_s8 + $0x70] sm:$0xf0] }
 0x151   :  { %v775_v62 = vmul.f32 1.442695, %v774_v61  ;;  %v1926_v61 = vor.u32 %v2188_v55, %v1925_v54  ;;  %v2031_v54 = vld [vmem:[%s3061_s8 + $0x1b0] sm:$0xf0]  ;;  %v2037_v55 = vld [vmem:[%s3061_s8 + $0x198] sm:$0xf] }
 0x153   :  { %2227 = vpow2.f32 %v775_v62  ;;  %v1885_v62 = vld [vmem:[%s3061_s8 + $0x80] sm:$0xf]  ;;  %1271 = vmatpush.bf16.msrb.mxu1 %v1926_v61  ;;  %v2034_v61 = vor.u32 %v2209_v53, %v2031_v54  ;;  %v2174_v53 = vld [vmem:[%s3061_s8 + $0x74] sm:$0xf0]  ;;  %v2170_v54 = vld [vmem:[%s3061_s8 + $0x5c] sm:$0xf] }
 0x154   :  { %v772_v63 = vpop.f32.mrf.mxu0 }
 0x155   :  { %v2179_v63 = vld [vmem:[%s3061_s8 + $0x9c] sm:$0xf0] }
 0x156   :  { %v1886_v7 = vor.u32 %v2179_v63, %v1885_v62  ;;  %v2038_v62 = vor.u32 %v2214_v56, %v2037_v55  ;;  %v2042_v63 = vor.u32 %v2210_v57, %v2039_v58  ;;  %v1879_v55 = vld [vmem:[%s3061_s8 + $0x78] sm:$0xf0]  ;;  %v1874_v56 = vor.u32 %v2169_v49, %v1871_v50  ;;  %v1837_v58 = vld [vmem:[%s3061_s8 + $0x10] sm:$0xf] }
 0x157   :  { %1272 = vmatpush.bf16.msrb.mxu1 %v1894_v9  ;;  %v2202_v9 = vld [vmem:[%s3061_s8 + $0x15c] sm:$0xf] }
 0x158   :  { %1246 = vmatpush.bf16.msra.mxu2 %v1886_v7  ;;  %1333 = vmatpush.bf16.msra.mxu0 %v2042_v63  ;;  %v2010_v11 = vor.u32 %v2202_v9, %v2007_v10  ;;  %v1839_v63 = vld [vmem:[%s3061_s8 + $0x30] sm:$0xf0] }
 0x159   :  { %v2228_v0 = vpop.eup %2227 }
 0x15a   :  { %778 = vrot.lane.b32.xlu0 %v2228_v0, %s2261_s23  ;;  %v2175_v0 = vld [vmem:[%s3061_s8 + $0x84] sm:$0xf] }
 0x15b   :  { %v1890_v8 = vor.u32 %v2175_v0, %v1887_v2  ;;  %1273 = vmatpush.bf16.msrb.mxu1 %v1862_v23  ;;  %v1997_v0 = vld [vmem:[%s3061_s8 + $0x150] sm:$0xf]  ;;  %v2201_v2 = vld [vmem:[%s3061_s8 + $0x154] sm:$0xf] }
 0x15c   :  { %1247 = vmatpush.bf16.msra.mxu2 %v1854_v20  ;;  %v1998_v3 = vor.u32 %v2205_v1, %v1997_v0  ;;  %v2002_v7 = vor.u32 %v2201_v2, %v1999_v4  ;;  %1334 = vmatpush.bf16.msra.mxu0 %v2010_v11  ;;  %v1974_v20 = vor.u32 %v2198_v18, %v1973_v17  ;;  %v1845_v0 = vld [vmem:[%s3061_s8 + $0x18] sm:$0xf]  ;;  %v2162_v2 = vld [vmem:[%s3061_s8 + $0x1c] sm:$0xf] }
 0x15d   :  { %1259 = vmatpush.bf16.msra.mxu3 %v1890_v8  ;;  %v2006_v8 = vor.u32 %v2206_v6, %v2005_v5  ;;  %v2166_v1 = vld [vmem:[%s3061_s8 + $0x34] sm:$0xf0] }
 0x15e   :  { %v1846_v6 = vor.u32 %v2166_v1, %v1845_v0 }
 0x15f   :  { %1274 = vmatpush.bf16.msrb.mxu1 %v1830_v45  ;;  %v1910_v45 = vor.u32 %v2182_v43, %v1909_v42 }
 0x160   :  { %1248 = vmatpush.bf16.msra.mxu2 %v1822_v36  ;;  %v1946_v36 = vor.u32 %v2186_v33, %v1943_v34 }
 0x161   :  { %1260 = vmatpush.bf16.msra.mxu3 %v1858_v22  ;;  %v1975_v22 = vld [vmem:[%s3061_s8 + $0x138] sm:$0xf0] }
 0x162   :  { %v1978_v23 = vor.u32 %v2194_v21, %v1975_v22 }
 0x164   :  { %1293 = vmatpush.bf16.msrb.mxu2 %v2062_v47  ;;  %1335 = vmatpush.bf16.msra.mxu0 %v1978_v23  ;;  %v2173_v47 = vld [vmem:[%s3061_s8 + $0x6c] sm:$0xf0] }
 0x165   :  { %1261 = vmatpush.bf16.msra.mxu3 %v1826_v41  ;;  %v1906_v41 = vor.u32 %v2177_v38, %v1903_v39 }
 0x168   :  { %1294 = vmatpush.bf16.msrb.mxu2 %v2030_v59  ;;  %1336 = vmatpush.bf16.msra.mxu0 %v1946_v36  ;;  %v2165_v59 = vld [vmem:[%s3061_s8 + $0x2c] sm:$0xf0] }
 0x169   :  { %1306 = vmatpush.bf16.msrb.mxu3 %v2066_v48  ;;  %v1914_v48 = vor.u32 %v2178_v44, %v1911_v46  ;;  %v1838_v4 = vor.u32 %v2165_v59, %v1837_v58 }
 0x16c   :  { %1295 = vmatpush.bf16.msrb.mxu2 %v1998_v3  ;;  %1337 = vmatpush.bf16.msra.mxu0 %v1914_v48  ;;  %v1847_v3 = vld [vmem:[%s3061_s8 + $0x38] sm:$0xf0] }
 0x16d   :  { %1307 = vmatpush.bf16.msrb.mxu3 %v2034_v61  ;;  %v2161_v61 = vld [vmem:[%s3061_s8 + $0x14] sm:$0xf] }
 0x16e   :  { %v1842_v5 = vor.u32 %v2161_v61, %v1839_v63 }
 0x170   :  { %1296 = vmatpush.bf16.msrb.mxu2 %v1966_v15 }
 0x171   :  { %1308 = vmatpush.bf16.msrb.mxu3 %v2002_v7  ;;  %v1850_v7 = vor.u32 %v2162_v2, %v1847_v3 }
 0x1cc   :  { %v779_v27 = vpop.permute.xlu0 %778 }
 0x1cd   :  { %v781_v32 = vmul.f32 %v779_v27, %v42_v19  ;;  %v1970_v19 = vor.u32 %v2193_v14, %v1967_v16  ;;  %v1934_v27 = vor.u32 %v2189_v25, %v1933_v24  ;;  %v2969_v14 = vld [vmem:[%s3063_s9] sm:$0xff] }
 0x1ce   :  { %v907_v15 = vperm.slane %v2969_v14, 2  ;;  %v908_v16 = vperm.slane %v2969_v14, 3  ;;  %v905_v21 = vperm.slane %v2969_v14, 0  ;;  %v906_v22 = vperm.slane %v2969_v14, 1 }
 0x1cf   :  { %v782_v40 = vadd.f32 %v781_v32, %v2565_v60  ;;  %1309 = vmatpush.bf16.msrb.mxu3 %v1970_v19  ;;  %v1942_v32 = vor.u32 %v2190_v30, %v1941_v29  ;;  %1297 = vmatpush.bf16.msrb.mxu2 %v1934_v27  ;;  %v911_v39 = vperm.slane %v2969_v14, 6  ;;  %v909_v50 = vperm.slane %v2969_v14, 4 }
 0x1d1   :  { %v783_v60 = vpack.c.bf16 %v782_v40, %v782_v40  ;;  %v1902_v40 = vor.u32 %v2181_v37, %v1901_v35 }
 0x1d3   :  { %1818 = vmatmul.msk.bf16.vlgmr.msra.gmra.mxu1 %vm820_vm0, %v783_v60  ;;  %1310 = vmatpush.bf16.msrb.mxu3 %v1938_v31  ;;  %v1869_v60 = vld [vmem:[%s3061_s8 + $0x50] sm:$0xf] }
 0x1d4   :  { %1319 = vmatpush.bf16.msra.mxu1 %v2070_v51  ;;  %v1877_v51 = vld [vmem:[%s3061_s8 + $0x58] sm:$0xf]  ;;  %1298 = vmatpush.bf16.msrb.mxu2 %v1902_v40  ;;  %v1870_v52 = vor.u32 %v2173_v47, %v1869_v60  ;;  %v912_v40 = vperm.slane %v2969_v14, 7 }
 0x1d5   :  { %v1878_v57 = vor.u32 %v2174_v53, %v1877_v51 }
 0x1d7   :  { %1311 = vmatpush.bf16.msrb.mxu3 %v1906_v41 }
 0x1d8   :  { %1320 = vmatpush.bf16.msra.mxu1 %v2038_v62  ;;  %v1882_v62 = vor.u32 %v2170_v54, %v1879_v55  ;;  %1299 = vmatpush.bf16.msrb.mxu2 %v1870_v52  ;;  %v910_v54 = vperm.slane %v2969_v14, 5 }
 0x1da   :  { %1338 = vmatpush.bf16.msra.mxu0 %v1882_v62 }
 0x1db   :  { %1312 = vmatpush.bf16.msrb.mxu3 %v1874_v56 }
 0x1dc   :  { %1321 = vmatpush.bf16.msra.mxu1 %v2006_v8  ;;  %1300 = vmatpush.bf16.msrb.mxu2 %v1838_v4  ;;  %v2226_v8 = vld [vmem:[%s3060_s7] ss:$0 sm:$0xff] }
 0x1de   :  { %1339 = vmatpush.bf16.msra.mxu0 %v1850_v7 }
 0x1df   :  { %1313 = vmatpush.bf16.msrb.mxu3 %v1842_v5 }
 0x1e0   :  { %1322 = vmatpush.bf16.msra.mxu1 %v1974_v20 }
 0x1e4   :  { %1323 = vmatpush.bf16.msra.mxu1 %v1942_v32 }
 0x1e8   :  { %1324 = vmatpush.bf16.msra.mxu1 %v1910_v45 }
 0x1ec   :  { %1325 = vmatpush.bf16.msra.mxu1 %v1878_v57 }
 0x1f0   :  { %1326 = vmatpush.bf16.msra.mxu1 %v1846_v6 }
 0x250   :  { %v833_v9 = vpop.f32.mrf.mxu1 }
 0x251   :  { %v834_v10 = vadd.f32 %v2226_v8, %v833_v9 }
 0x253   :  { %v837_v11 = vmax.f32 %v834_v10, 0.0 }
 0x255   :  { %v838_v12 = vpack.c.bf16 %v837_v11, %v837_v11 }
 0x257   :  { %1249 = vmatmul.bf16.vlgmr.msra.gmra.mxu2 %v838_v12  ;;  %1262 = vmatmul.bf16.vlgmr.msra.gmra.mxu3 %v838_v12 }
 0x258   :  { %1275 = vmatmul.bf16.vlgmr.msrb.gmra.mxu1 %v838_v12  ;;  %1288 = vmatmul.bf16.vlgmr.msrb.gmra.mxu0 %v838_v12  ;;  %v835_v13 = vpop.f32.mrf.mxu1 }
 0x267   :  { %1301 = vmatmul.bf16.vlgmr.msrb.gmra.mxu2 %v838_v12  ;;  %1314 = vmatmul.bf16.vlgmr.msrb.gmra.mxu3 %v838_v12 }
 0x268   :  { %1327 = vmatmul.bf16.vlgmr.msra.gmra.mxu1 %v838_v12  ;;  %1340 = vmatmul.bf16.vlgmr.msra.gmra.mxu0 %v838_v12 }
 0x2d5   :  { %v1276_v17 = vpop.f32.mrf.mxu1  ;;  %v1289_v18 = vpop.f32.mrf.mxu0 }
 0x2d6   :  { %v1277_v19 = vadd.f32 %v1276_v17, %v907_v15  ;;  %v1290_v20 = vadd.f32 %v1289_v18, %v908_v16 }
 0x2d8   :  { %v2077_v23 = vmul.f32 -1.442695, %v1277_v19  ;;  %v2078_v24 = vmul.f32 -1.442695, %v1290_v20 }
 0x2da   :  { %2229 = vpow2.f32 %v2077_v23  ;;  %v1250_v25 = vpop.f32.mrf.mxu2  ;;  %v1263_v26 = vpop.f32.mrf.mxu3 }
 0x2db   :  { %2231 = vpow2.f32 %v2078_v24  ;;  %v1251_v27 = vadd.f32 %v1250_v25, %v905_v21  ;;  %v1264_v28 = vadd.f32 %v1263_v26, %v906_v22 }
 0x2dd   :  { %v2075_v29 = vmul.f32 -1.442695, %v1251_v27  ;;  %v2076_v30 = vmul.f32 -1.442695, %v1264_v28  ;;  %v1278_v31 = vpop.f32.mrf.mxu1  ;;  %v1291_v32 = vpop.f32.mrf.mxu0 }
 0x2df   :  { %2233 = vpow2.f32 %v2075_v29 }
 0x2e0   :  { %v2230_v33 = vpop.eup %2229  ;;  %2235 = vpow2.f32 %v2076_v30 }
 0x2e1   :  { %v2232_v34 = vpop.eup %2231  ;;  %v1371_v35 = vadd.f32 1.0, %v2230_v33 }
 0x2e2   :  { %v2975_v36 = vadd.f32 1.0, %v2232_v34  ;;  %v1252_v37 = vpop.f32.mrf.mxu2  ;;  %v1265_v38 = vpop.f32.mrf.mxu3 }
 0x2e3   :  { %2237 = vrcp.f32 %v1371_v35  ;;  %v1416_v46 = vand.u32 2147483647, %v1371_v35  ;;  %v1418_v60 = vand.u32 2147483648, %v1371_v35  ;;  %vm1412_vm1 = vweird.f32 %v1371_v35 }
 0x2e4   :  { %2239 = vrcp.f32 %v2975_v36  ;;  %v1431_v52 = vand.u32 2147483647, %v2975_v36  ;;  %v1433_v53 = vand.u32 2147483648, %v2975_v36  ;;  %vm1427_vm3 = vweird.f32 %v2975_v36 }
 0x2e5   :  { %v2234_v41 = vpop.eup %2233  ;;  %v1328_v42 = vpop.f32.mrf.mxu1  ;;  %vm2990_vm2 = vcmp.eq.f32.partialorder %v1416_v46, 8.507059e+37  ;;  %v1419_v61 = vor.u32 1.1754944e-38, %v1418_v60 }
 0x2e6   :  { %v1341_v43 = vpop.f32.mrf.mxu0  ;;  %v2236_v44 = vpop.eup %2235  ;;  %v2980_v45 = vadd.f32 1.0, %v2234_v41  ;;  %v1329_v48 = vadd.f32 %v1328_v42, %v911_v39  ;;  %vm2996_vm4 = vcmp.eq.f32.partialorder %v1431_v52, 8.507059e+37  ;;  %v1434_v5 = vor.u32 1.1754944e-38, %v1433_v53 }
 0x2e7   :  { %v2982_v47 = vadd.f32 1.0, %v2236_v44  ;;  %v1342_v49 = vadd.f32 %v1341_v43, %v912_v40 }
 0x2e8   :  { %2241 = vrcp.f32 %v2980_v45  ;;  %v2081_v0 = vmul.f32 -1.442695, %v1329_v48  ;;  %v1386_v16 = vand.u32 2147483647, %v2980_v45  ;;  %v1388_v17 = vand.u32 2147483648, %v2980_v45 }
 0x2e9   :  { %v2238_v51 = vpop.eup %2237  ;;  %2243 = vrcp.f32 %v2982_v47  ;;  %v2082_v1 = vmul.f32 -1.442695, %v1342_v49  ;;  %v1403_v24 = vand.u32 2147483648, %v2982_v47  ;;  %v1401_v33 = vand.u32 2147483647, %v2982_v47 }
 0x2ea   :  { %v2240_v55 = vpop.eup %2239  ;;  %v1408_v56 = vmul.f32 %v2238_v51, %v1371_v35  ;;  %v1302_v57 = vpop.f32.mrf.mxu2  ;;  %vm1413_vm5 = vweird.f32 %v2238_v51  ;;  %2245 = vpow2.f32 %v2081_v0  ;;  %vm1382_vm11 = vweird.f32 %v2980_v45 }
 0x2eb   :  { %v1315_v58 = vpop.f32.mrf.mxu3  ;;  %v1423_v62 = vmul.f32 %v2240_v55, %v2975_v36  ;;  %v1303_v2 = vadd.f32 %v1302_v57, %v909_v50  ;;  %vm1428_vm6 = vweird.f32 %v2240_v55  ;;  %2247 = vpow2.f32 %v2082_v1  ;;  %vm1414_vm7 = vmor %vm1412_vm1, %vm1413_vm5 }
 0x2ec   :  { %v1409_v63 = vsub.f32 1.0, %v1408_v56  ;;  %v1316_v6 = vadd.f32 %v1315_v58, %v910_v54  ;;  %vm1429_vm8 = vmor %vm1427_vm3, %vm1428_vm6  ;;  %v1389_v37 = vor.u32 1.1754944e-38, %v1388_v17  ;;  %vm1397_vm13 = vweird.f32 %v2982_v47 }
 0x2ed   :  { %v1424_v3 = vsub.f32 1.0, %v1423_v62  ;;  %v1330_v7 = vpop.f32.mrf.mxu1  ;;  %v2079_v11 = vmul.f32 -1.442695, %v1303_v2  ;;  %vm1387_vm14 = vcmp.eq.f32.partialorder %v1386_v16, 8.507059e+37  ;;  %v1404_v42 = vor.u32 1.1754944e-38, %v1403_v24 }
 0x2ee   :  { %v1343_v8 = vpop.f32.mrf.mxu0  ;;  %v2242_v9 = vpop.eup %2241  ;;  %v1410_v10 = vmul.f32 %v2238_v51, %v1409_v63  ;;  %v2080_v21 = vmul.f32 -1.442695, %v1316_v6  ;;  %vm1402_vm0 = vcmp.eq.f32.partialorder %v1401_v33, 8.507059e+37 }
 0x2ef   :  { %v2244_v12 = vpop.eup %2243  ;;  %v1425_v13 = vmul.f32 %v2240_v55, %v1424_v3  ;;  %v1378_v14 = vmul.f32 %v2242_v9, %v2980_v45  ;;  %2249 = vpow2.f32 %v2079_v11  ;;  %vm1383_vm9 = vweird.f32 %v2242_v9 }
 0x2f0   :  { %v1411_v15 = vadd.f32 %v2238_v51, %v1410_v10  ;;  %v1393_v18 = vmul.f32 %v2244_v12, %v2982_v47  ;;  %2251 = vpow2.f32 %v2080_v21  ;;  %v2246_v30 = vpop.eup %2245  ;;  %vm1398_vm10 = vweird.f32 %v2244_v12  ;;  %vm1384_vm12 = vmor %vm1382_vm11, %vm1383_vm9 }
 0x2f1   :  { %v1426_v19 = vadd.f32 %v2240_v55, %v1425_v13  ;;  %v1379_v20 = vsub.f32 1.0, %v1378_v14  ;;  %v2248_v34 = vpop.eup %2247  ;;  %v1375_v36 = vadd.f32 1.0, %v2246_v30  ;;  %vm1399_vm15 = vmor %vm1397_vm13, %vm1398_vm10 }
 0x2f2   :  { %v1415_v22 = vsel %vm1414_vm7, %v2238_v51, %v1411_v15  ;;  %v1394_v23 = vsub.f32 1.0, %v1393_v18  ;;  %v1304_v25 = vpop.f32.mrf.mxu2  ;;  %v1376_v39 = vadd.f32 1.0, %v2248_v34 }
 0x2f3   :  { %v1317_v26 = vpop.f32.mrf.mxu3  ;;  %v1420_v27 = vsel %vm2990_vm2, %v1419_v61, %v1415_v22  ;;  %v1430_v28 = vsel %vm1429_vm8, %v2240_v55, %v1426_v19  ;;  %v1380_v29 = vmul.f32 %v2242_v9, %v1379_v20  ;;  %2253 = vrcp.f32 %v1375_v36 }
 0x2f4   :  { %1499 = vst [vmem:[%s3064_s10 + $0x10] sm:$0xff] %v1420_v27  ;;  %v1435_v31 = vsel %vm2996_vm4, %v1434_v5, %v1430_v28  ;;  %v1395_v32 = vmul.f32 %v2244_v12, %v1394_v23  ;;  %2255 = vrcp.f32 %v1376_v39  ;;  %v1476_v51 = vand.u32 2147483647, %v1375_v36 }
 0x2f5   :  { %1500 = vst [vmem:[%s3064_s10 + $0x18] sm:$0xff] %v1435_v31  ;;  %v1381_v35 = vadd.f32 %v2242_v9, %v1380_v29  ;;  %v2250_v40 = vpop.eup %2249  ;;  %v1478_v54 = vand.u32 2147483648, %v1375_v36  ;;  %v1491_v55 = vand.u32 2147483647, %v1376_v39  ;;  %v1493_v57 = vand.u32 2147483648, %v1376_v39 }
 0x2f6   :  { %v1396_v38 = vadd.f32 %v2244_v12, %v1395_v32  ;;  %v2252_v45 = vpop.eup %2251  ;;  %v1373_v60 = vadd.f32 1.0, %v2250_v40  ;;  %vm1472_vm1 = vweird.f32 %v1375_v36  ;;  %vm3029_vm3 = vcmp.eq.f32.partialorder %v1476_v51, 8.507059e+37 }
 0x2f7   :  { %v1385_v41 = vsel %vm1384_vm12, %v2242_v9, %v1381_v35  ;;  %v1374_v47 = vadd.f32 1.0, %v2252_v45  ;;  %vm1487_vm4 = vweird.f32 %v1376_v39  ;;  %v1479_v2 = vor.u32 1.1754944e-38, %v1478_v54 }
 0x2f8   :  { %v1390_v43 = vsel %vm1387_vm14, %v1389_v37, %v1385_v41  ;;  %v1400_v44 = vsel %vm1399_vm15, %v2244_v12, %v1396_v38  ;;  %2257 = vrcp.f32 %v1373_v60  ;;  %vm3033_vm6 = vcmp.eq.f32.partialorder %v1491_v55, 8.507059e+37 }
 0x2f9   :  { %1497 = vst [vmem:[%s3064_s10] sm:$0xff] %v1390_v43  ;;  %v1405_v46 = vsel %vm1402_vm0, %v1404_v42, %v1400_v44  ;;  %v2254_v48 = vpop.eup %2253  ;;  %2259 = vrcp.f32 %v1374_v47  ;;  %v1494_v6 = vor.u32 1.1754944e-38, %v1493_v57  ;;  %v1446_v8 = vand.u32 2147483647, %v1373_v60 }
 0x2fa   :  { %1498 = vst [vmem:[%s3064_s10 + $0x8] sm:$0xff] %v1405_v46  ;;  %v2256_v49 = vpop.eup %2255  ;;  %v1468_v50 = vmul.f32 %v2254_v48, %v1375_v36  ;;  %vm1473_vm2 = vweird.f32 %v2254_v48  ;;  %v1448_v10 = vand.u32 2147483648, %v1373_v60  ;;  %v1463_v12 = vand.u32 2147483648, %v1374_v47 }
 0x2fb   :  { %v1483_v52 = vmul.f32 %v2256_v49, %v1376_v39  ;;  %vm1488_vm5 = vweird.f32 %v2256_v49  ;;  %vm1474_vm7 = vmor %vm1472_vm1, %vm1473_vm2  ;;  %v1461_v18 = vand.u32 2147483647, %v1374_v47  ;;  %vm1442_vm11 = vweird.f32 %v1373_v60 }
 0x2fc   :  { %v1469_v53 = vsub.f32 1.0, %v1468_v50  ;;  %vm1489_vm8 = vmor %vm1487_vm4, %vm1488_vm5  ;;  %v1449_v20 = vor.u32 1.1754944e-38, %v1448_v10  ;;  %vm1457_vm13 = vweird.f32 %v1374_v47  ;;  %vm1447_vm14 = vcmp.eq.f32.partialorder %v1446_v8, 8.507059e+37 }
 0x2fd   :  { %v1484_v56 = vsub.f32 1.0, %v1483_v52  ;;  %v1464_v23 = vor.u32 1.1754944e-38, %v1463_v12  ;;  %vm1462_vm0 = vcmp.eq.f32.partialorder %v1461_v18, 8.507059e+37 }
 0x2fe   :  { %v2258_v58 = vpop.eup %2257  ;;  %v1470_v59 = vmul.f32 %v2254_v48, %v1469_v53 }
 0x2ff   :  { %v2260_v62 = vpop.eup %2259  ;;  %v1485_v63 = vmul.f32 %v2256_v49, %v1484_v56  ;;  %v1438_v0 = vmul.f32 %v2258_v58, %v1373_v60  ;;  %vm1443_vm9 = vweird.f32 %v2258_v58 }
 0x300   :  { %v1471_v1 = vadd.f32 %v2254_v48, %v1470_v59  ;;  %v1453_v4 = vmul.f32 %v2260_v62, %v1374_v47  ;;  %vm1458_vm10 = vweird.f32 %v2260_v62  ;;  %vm1444_vm12 = vmor %vm1442_vm11, %vm1443_vm9 }
 0x301   :  { %v1486_v5 = vadd.f32 %v2256_v49, %v1485_v63  ;;  %v1439_v7 = vsub.f32 1.0, %v1438_v0  ;;  %vm1459_vm15 = vmor %vm1457_vm13, %vm1458_vm10 }
 0x302   :  { %v1475_v9 = vsel %vm1474_vm7, %v2254_v48, %v1471_v1  ;;  %v1454_v11 = vsub.f32 1.0, %v1453_v4 }
 0x303   :  { %v1480_v13 = vsel %vm3029_vm3, %v1479_v2, %v1475_v9  ;;  %v1490_v14 = vsel %vm1489_vm8, %v2256_v49, %v1486_v5  ;;  %v1440_v15 = vmul.f32 %v2258_v58, %v1439_v7 }
 0x304   :  { %1503 = vst [vmem:[%s3064_s10 + $0x30] sm:$0xff] %v1480_v13  ;;  %v1495_v16 = vsel %vm3033_vm6, %v1494_v6, %v1490_v14  ;;  %v1455_v17 = vmul.f32 %v2260_v62, %v1454_v11 }
 0x305   :  { %1504 = vst [vmem:[%s3064_s10 + $0x38] sm:$0xff] %v1495_v16  ;;  %v1441_v19 = vadd.f32 %v2258_v58, %v1440_v15 }
 0x306   :  { %v1456_v21 = vadd.f32 %v2260_v62, %v1455_v17 }
 0x307   :  { %v1445_v22 = vsel %vm1444_vm12, %v2258_v58, %v1441_v19 }
 0x308   :  { %v1450_v24 = vsel %vm1447_vm14, %v1449_v20, %v1445_v22  ;;  %v1460_v25 = vsel %vm1459_vm15, %v2260_v62, %v1456_v21 }
 0x309   :  { %1501 = vst [vmem:[%s3064_s10 + $0x20] sm:$0xff] %v1450_v24  ;;  %v1465_v26 = vsel %vm1462_vm0, %v1464_v23, %v1460_v25 }
 0x30a   :  { %1502 = vst [vmem:[%s3064_s10 + $0x28] sm:$0xff] %v1465_v26 }

</bundles_post_ra>
